<compile_context>
chip_gen: v7x
topology: tpu7x:2x2x1
jax: 0.10.0
libtpu: 0.0.40
codegen_flags: <defaults>
</compile_context>

<pallas_src>
import jax
import jax.numpy as jnp
from jax.experimental import pallas as pl
from jax.experimental.pallas import tpu as pltpu

NUM_NODES = 64
BN_EPS = 1e-5
MAX_TILE_B = 8192          # hard cap on rows per grid step
MIN_GRID_STEPS = 2         # keep both v7x TensorCores busy whenever B allows
VMEM_TILE_BUDGET = 10 << 20  # bytes; stays under v5e's 16 MiB scoped-VMEM default


def _round_up(x, m):
    return ((x + m - 1) // m) * m


def _choose_tile_b(batch, in_size, out_size, x_itemsize):
    """Pick the batch tile: as large as the VMEM budget allows, >=2 grid steps when
    possible (v7x megacore), multiple of 16, and == batch for tiny batches so the
    block always satisfies the (8,128)/full-dim rule."""
    # Conservative per-row VMEM estimate: double-buffered x/out pipeline buffers plus
    # the kernel's live f32 matmul results and bf16 activations.
    per_row = (2 * in_size * x_itemsize        # x tile, double-buffered
               + in_size * 2                   # bf16 copy of x
               + 3 * NUM_NODES * 4             # live f32 matmul results
               + 2 * NUM_NODES * 2             # live bf16 activations
               + 3 * out_size * 4)             # out tile (double-buffered) + f32 result
    max_tile = max(16, min(MAX_TILE_B, (VMEM_TILE_BUDGET // per_row) // 16 * 16))
    num_steps = max(MIN_GRID_STEPS, pl.cdiv(batch, max_tile))
    tile_b = min(max_tile, _round_up(pl.cdiv(batch, num_steps), 16))
    if tile_b >= batch:
        tile_b = batch                          # single full block (always legal)
    return tile_b


def _ann_kernel(x_ref, w1_ref, w2_ref, w3_ref, wo_ref, bh_ref, bo_ref, out_ref):
    """Fused 3x(Linear[+BN folded]+ReLU) + Linear head for one batch tile.

    x_ref:  [TILE_B, in]  native dtype (f32); cast to bf16 in-kernel
    w*_ref: bf16 weights, BN-folded, laid out [in_features, out_features]
    bh_ref: [3, 64] f32 packed hidden biases (BN-folded)
    bo_ref: [1, out] f32 output bias
    """
    bh = bh_ref[...]                            # [3, 64] f32

    # In-kernel down-cast: hidden under the x DMA, removes the wrapper-side cast pass.
    x = x_ref[...].astype(jnp.bfloat16)

    # Block 1: Linear + folded-BN bias + ReLU (f32 epilogue, bf16 intermediate).
    h = jnp.dot(x, w1_ref[...], preferred_element_type=jnp.float32)
    h = jnp.maximum(h + bh[0:1, :], 0.0).astype(jnp.bfloat16)

    # Block 2
    h = jnp.dot(h, w2_ref[...], preferred_element_type=jnp.float32)
    h = jnp.maximum(h + bh[1:2, :], 0.0).astype(jnp.bfloat16)

    # Block 3
    h = jnp.dot(h, w3_ref[...], preferred_element_type=jnp.float32)
    h = jnp.maximum(h + bh[2:3, :], 0.0).astype(jnp.bfloat16)

    # Output head (no activation)
    out = jnp.dot(h, wo_ref[...], preferred_element_type=jnp.float32) + bo_ref[...]
    out_ref[...] = out.astype(out_ref.dtype)


def ann_forward(x, params):
    """x: [B, input_size] float32 (or bf16).  params: folded kernel params."""
    B, in_size = x.shape
    out_size = params["wo"].shape[1]

    tile_b = _choose_tile_b(B, in_size, out_size, x.dtype.itemsize)
    num_tiles = pl.cdiv(B, tile_b)

    w1, w2, w3, wo = params["w1"], params["w2"], params["w3"], params["wo"]
    bh, bo = params["bh"], params["bo"]

    # FLOP / byte estimate for the XLA scheduler (x streamed once, no wrapper passes).
    flops = 2 * B * (in_size * NUM_NODES
                     + NUM_NODES * NUM_NODES * 2
                     + NUM_NODES * out_size)
    weight_bytes = sum(int(a.size) * a.dtype.itemsize for a in (w1, w2, w3, wo, bh, bo))
    bytes_accessed = B * (in_size * x.dtype.itemsize + out_size * 4) + weight_bytes
    cost = pl.CostEstimate(flops=int(flops), transcendentals=0,
                           bytes_accessed=int(bytes_accessed))

    # Grid-invariant operands: constant index_map -> fetched once, kept resident.
    resident = lambda shape: pl.BlockSpec(shape, lambda i: (0,) * len(shape))

    out = pl.pallas_call(
        _ann_kernel,
        out_shape=jax.ShapeDtypeStruct((B, out_size), jnp.float32),
        grid=(num_tiles,),
        in_specs=[
            pl.BlockSpec((tile_b, in_size), lambda i: (i, 0)),   # x: batch-tiled
            resident(w1.shape),                                  # weights stay in VMEM
            resident(w2.shape),
            resident(w3.shape),
            resident(wo.shape),
            resident(bh.shape),
            resident(bo.shape),
        ],
        out_specs=pl.BlockSpec((tile_b, out_size), lambda i: (i, 0)),
        compiler_params=pltpu.CompilerParams(
            dimension_semantics=("parallel",)),                  # megacore batch split
        cost_estimate=cost,
    )(x, w1, w2, w3, wo, bh, bo)

    return out


def init_params(key, input_size, output_size):
    """Deterministic synthetic parameters with PyTorch Linear/BN shapes, pre-folded.

    PyTorch Linear weight is [out, in]; we store the transpose [in, out].
    BatchNorm1d(gamma, beta, running_mean, running_var) is folded together with the
    preceding Linear bias:  W' = W * s (per output column),  b' = b * s + t,
    where s = gamma / sqrt(run_var + eps), t = beta - run_mean * s.
    Weights are stored bf16 (MXU-native); biases stay f32.
    """
    def linear(key, fan_in, fan_out):
        kw, kb = jax.random.split(key)
        bound = 1.0 / jnp.sqrt(fan_in)
        w = jax.random.uniform(kw, (fan_in, fan_out), jnp.float32, -bound, bound)
        b = jax.random.uniform(kb, (1, fan_out), jnp.float32, -bound, bound)
        return w, b

    def bn_fold(key, feat):
        kg, kb, km, kv = jax.random.split(key, 4)
        gamma = 1.0 + 0.1 * jax.random.normal(kg, (1, feat), jnp.float32)
        beta = 0.1 * jax.random.normal(kb, (1, feat), jnp.float32)
        run_mean = 0.1 * jax.random.normal(km, (1, feat), jnp.float32)
        run_var = jnp.abs(1.0 + 0.1 * jax.random.normal(kv, (1, feat), jnp.float32))
        scale = gamma / jnp.sqrt(run_var + BN_EPS)
        shift = beta - run_mean * scale
        return scale, shift

    keys = jax.random.split(key, 7)
    w1, b1 = linear(keys[0], input_size, NUM_NODES)
    s1, t1 = bn_fold(keys[1], NUM_NODES)
    w2, b2 = linear(keys[2], NUM_NODES, NUM_NODES)
    s2, t2 = bn_fold(keys[3], NUM_NODES)
    w3, b3 = linear(keys[4], NUM_NODES, NUM_NODES)
    s3, t3 = bn_fold(keys[5], NUM_NODES)
    wo, bo = linear(keys[6], NUM_NODES, output_size)

    # Fold BN into the Linear weights / biases (eval-mode exact).
    w1f, b1f = w1 * s1, b1 * s1 + t1
    w2f, b2f = w2 * s2, b2 * s2 + t2
    w3f, b3f = w3 * s3, b3 * s3 + t3

    bh = jnp.concatenate([b1f, b2f, b3f], axis=0)  # [3, 64] packed hidden biases

    return dict(
        w1=w1f.astype(jnp.bfloat16),
        w2=w2f.astype(jnp.bfloat16),
        w3=w3f.astype(jnp.bfloat16),
        wo=wo.astype(jnp.bfloat16),
        bh=bh.astype(jnp.float32),
        bo=bo.astype(jnp.float32),
    )


def ann_reference(x, p):
    """Pure-JAX reference with the same bf16-matmul / f32-accumulate numerics."""
    h = jnp.dot(x.astype(jnp.bfloat16), p["w1"], preferred_element_type=jnp.float32)
    h = jnp.maximum(h + p["bh"][0:1, :], 0.0)
    h = jnp.dot(h.astype(jnp.bfloat16), p["w2"], preferred_element_type=jnp.float32)
    h = jnp.maximum(h + p["bh"][1:2, :], 0.0)
    h = jnp.dot(h.astype(jnp.bfloat16), p["w3"], preferred_element_type=jnp.float32)
    h = jnp.maximum(h + p["bh"][2:3, :], 0.0)
    return jnp.dot(h.astype(jnp.bfloat16), p["wo"],
                   preferred_element_type=jnp.float32) + p["bo"]


if __name__ == "__main__":
    key = jax.random.PRNGKey(0)
    k_x, k_x2, k_p = jax.random.split(key, 3)

    batch, input_size, output_size = 8, 32, 8
    params = init_params(k_p, input_size, output_size)

    # Small single-tile case (tile_b == batch, one grid step).
    x = jax.random.normal(k_x, (batch, input_size), jnp.float32)
    out = jax.block_until_ready(ann_forward(x, params))
    ref = ann_reference(x, params)
    assert out.shape == (batch, output_size)
    assert jnp.allclose(out, ref, atol=1e-2, rtol=1e-2), "mismatch vs reference (small)"

    # Multi-tile case: 2 grid steps with a ragged last block (no wrapper-side padding).
    x2 = jax.random.normal(k_x2, (100, input_size), jnp.float32)
    out2 = jax.block_until_ready(ann_forward(x2, params))
    ref2 = ann_reference(x2, params)
    assert out2.shape == (100, output_size)
    assert jnp.allclose(out2, ref2, atol=1e-2, rtol=1e-2), "mismatch vs reference (multi)"

    print("KERNEL_OK")
</pallas_src>

<mosaic_0001>
module attributes {stable_mosaic.version = 11 : i64} {
  func.func @_ann_kernel(%arg0: i32, %arg1: memref<8x32xf32, #tpu.memory_space<vmem>>, %arg2: memref<32x64xbf16, #tpu.memory_space<vmem>>, %arg3: memref<64x64xbf16, #tpu.memory_space<vmem>>, %arg4: memref<64x64xbf16, #tpu.memory_space<vmem>>, %arg5: memref<64x8xbf16, #tpu.memory_space<vmem>>, %arg6: memref<3x64xf32, #tpu.memory_space<vmem>>, %arg7: memref<1x8xf32, #tpu.memory_space<vmem>>, %arg8: memref<8x8xf32, #tpu.memory_space<vmem>>) attributes {dimension_semantics = [#tpu.dimension_semantics<parallel>], iteration_bounds = array<i64: 1>, scalar_prefetch = 0 : i64, scratch_operands = 0 : i64, tpu.core_type = #tpu.core_type<tc>, window_params = [{transform_indices = @transform_0, window_bounds = array<i64: 8, 32>}, {pipeline_mode = #tpu.pipeline_mode<synchronous>, transform_indices = @transform_1, window_bounds = array<i64: 32, 64>}, {pipeline_mode = #tpu.pipeline_mode<synchronous>, transform_indices = @transform_2, window_bounds = array<i64: 64, 64>}, {pipeline_mode = #tpu.pipeline_mode<synchronous>, transform_indices = @transform_3, window_bounds = array<i64: 64, 64>}, {pipeline_mode = #tpu.pipeline_mode<synchronous>, transform_indices = @transform_4, window_bounds = array<i64: 64, 8>}, {pipeline_mode = #tpu.pipeline_mode<synchronous>, transform_indices = @transform_5, window_bounds = array<i64: 3, 64>}, {pipeline_mode = #tpu.pipeline_mode<synchronous>, transform_indices = @transform_6, window_bounds = array<i64: 1, 8>}, {transform_indices = @transform_7, window_bounds = array<i64: 8, 8>}]} {
    %c0 = arith.constant 0 : index
    %c0_0 = arith.constant 0 : index
    %0 = vector.load %arg6[%c0, %c0_0] : memref<3x64xf32, #tpu.memory_space<vmem>>, vector<3x64xf32>
    %c0_1 = arith.constant 0 : index
    %c0_2 = arith.constant 0 : index
    %1 = vector.load %arg1[%c0_1, %c0_2] : memref<8x32xf32, #tpu.memory_space<vmem>>, vector<8x32xf32>
    %2 = arith.truncf %1 : vector<8x32xf32> to vector<8x32xbf16>
    %c0_3 = arith.constant 0 : index
    %c0_4 = arith.constant 0 : index
    %3 = vector.load %arg2[%c0_3, %c0_4] : memref<32x64xbf16, #tpu.memory_space<vmem>>, vector<32x64xbf16>
    %cst = arith.constant dense<0.000000e+00> : vector<8x64xf32>
    %4 = tpu.matmul %2, %3, %cst {dimension_numbers = #tpu.dot_dimension_numbers<[1], [0], [0], [1], [0, 0, 1, 1], [], []>} : vector<8x32xbf16>, vector<32x64xbf16>, vector<8x64xf32> -> vector<8x64xf32>
    %5 = vector.extract_strided_slice %0 {offsets = [0, 0], sizes = [1, 64], strides = [1, 1]} : vector<3x64xf32> to vector<1x64xf32>
    %6 = vector.broadcast %5 : vector<1x64xf32> to vector<8x64xf32>
    %7 = arith.addf %4, %6 : vector<8x64xf32>
    %cst_5 = arith.constant 0.000000e+00 : f32
    %8 = vector.broadcast %cst_5 : f32 to vector<8x64xf32>
    %9 = arith.maximumf %7, %8 : vector<8x64xf32>
    %10 = arith.truncf %9 : vector<8x64xf32> to vector<8x64xbf16>
    %c0_6 = arith.constant 0 : index
    %c0_7 = arith.constant 0 : index
    %11 = vector.load %arg3[%c0_6, %c0_7] : memref<64x64xbf16, #tpu.memory_space<vmem>>, vector<64x64xbf16>
    %cst_8 = arith.constant dense<0.000000e+00> : vector<8x64xf32>
    %12 = tpu.matmul %10, %11, %cst_8 {dimension_numbers = #tpu.dot_dimension_numbers<[1], [0], [0], [1], [0, 0, 1, 1], [], []>} : vector<8x64xbf16>, vector<64x64xbf16>, vector<8x64xf32> -> vector<8x64xf32>
    %13 = vector.extract_strided_slice %0 {offsets = [1, 0], sizes = [1, 64], strides = [1, 1]} : vector<3x64xf32> to vector<1x64xf32>
    %14 = vector.broadcast %13 : vector<1x64xf32> to vector<8x64xf32>
    %15 = arith.addf %12, %14 : vector<8x64xf32>
    %cst_9 = arith.constant 0.000000e+00 : f32
    %16 = vector.broadcast %cst_9 : f32 to vector<8x64xf32>
    %17 = arith.maximumf %15, %16 : vector<8x64xf32>
    %18 = arith.truncf %17 : vector<8x64xf32> to vector<8x64xbf16>
    %c0_10 = arith.constant 0 : index
    %c0_11 = arith.constant 0 : index
    %19 = vector.load %arg4[%c0_10, %c0_11] : memref<64x64xbf16, #tpu.memory_space<vmem>>, vector<64x64xbf16>
    %cst_12 = arith.constant dense<0.000000e+00> : vector<8x64xf32>
    %20 = tpu.matmul %18, %19, %cst_12 {dimension_numbers = #tpu.dot_dimension_numbers<[1], [0], [0], [1], [0, 0, 1, 1], [], []>} : vector<8x64xbf16>, vector<64x64xbf16>, vector<8x64xf32> -> vector<8x64xf32>
    %21 = vector.extract_strided_slice %0 {offsets = [2, 0], sizes = [1, 64], strides = [1, 1]} : vector<3x64xf32> to vector<1x64xf32>
    %22 = vector.broadcast %21 : vector<1x64xf32> to vector<8x64xf32>
    %23 = arith.addf %20, %22 : vector<8x64xf32>
    %cst_13 = arith.constant 0.000000e+00 : f32
    %24 = vector.broadcast %cst_13 : f32 to vector<8x64xf32>
    %25 = arith.maximumf %23, %24 : vector<8x64xf32>
    %26 = arith.truncf %25 : vector<8x64xf32> to vector<8x64xbf16>
    %c0_14 = arith.constant 0 : index
    %c0_15 = arith.constant 0 : index
    %27 = vector.load %arg5[%c0_14, %c0_15] : memref<64x8xbf16, #tpu.memory_space<vmem>>, vector<64x8xbf16>
    %cst_16 = arith.constant dense<0.000000e+00> : vector<8x8xf32>
    %28 = tpu.matmul %26, %27, %cst_16 {dimension_numbers = #tpu.dot_dimension_numbers<[1], [0], [0], [1], [0, 0, 1, 1], [], []>} : vector<8x64xbf16>, vector<64x8xbf16>, vector<8x8xf32> -> vector<8x8xf32>
    %c0_17 = arith.constant 0 : index
    %c0_18 = arith.constant 0 : index
    %29 = vector.load %arg7[%c0_17, %c0_18] : memref<1x8xf32, #tpu.memory_space<vmem>>, vector<1x8xf32>
    %30 = vector.broadcast %29 : vector<1x8xf32> to vector<8x8xf32>
    %31 = arith.addf %28, %30 : vector<8x8xf32>
    %c0_19 = arith.constant 0 : index
    %c0_20 = arith.constant 0 : index
    %32 = vector.load %arg8[%c0_19, %c0_20] : memref<8x8xf32, #tpu.memory_space<vmem>>, vector<8x8xf32>
    tpu.vector_store %arg8[%c0_19, %c0_20], %31 {strides = array<i32>} : memref<8x8xf32, #tpu.memory_space<vmem>>, vector<8x8xf32>,
    return
  }
  func.func @transform_0(%arg0: i32) -> (i32, i32) {
    %c0_i32 = arith.constant 0 : i32
    %c0_i32_0 = arith.constant 0 : i32
    return %arg0, %c0_i32 : i32, i32
  }
  func.func @transform_1(%arg0: i32) -> (i32, i32) {
    %c0_i32 = arith.constant 0 : i32
    %c0_i32_0 = arith.constant 0 : i32
    %c0_i32_1 = arith.constant 0 : i32
    return %c0_i32, %c0_i32_0 : i32, i32
  }
  func.func @transform_2(%arg0: i32) -> (i32, i32) {
    %c0_i32 = arith.constant 0 : i32
    %c0_i32_0 = arith.constant 0 : i32
    %c0_i32_1 = arith.constant 0 : i32
    return %c0_i32, %c0_i32_0 : i32, i32
  }
  func.func @transform_3(%arg0: i32) -> (i32, i32) {
    %c0_i32 = arith.constant 0 : i32
    %c0_i32_0 = arith.constant 0 : i32
    %c0_i32_1 = arith.constant 0 : i32
    return %c0_i32, %c0_i32_0 : i32, i32
  }
  func.func @transform_4(%arg0: i32) -> (i32, i32) {
    %c0_i32 = arith.constant 0 : i32
    %c0_i32_0 = arith.constant 0 : i32
    %c0_i32_1 = arith.constant 0 : i32
    return %c0_i32, %c0_i32_0 : i32, i32
  }
  func.func @transform_5(%arg0: i32) -> (i32, i32) {
    %c0_i32 = arith.constant 0 : i32
    %c0_i32_0 = arith.constant 0 : i32
    %c0_i32_1 = arith.constant 0 : i32
    return %c0_i32, %c0_i32_0 : i32, i32
  }
  func.func @transform_6(%arg0: i32) -> (i32, i32) {
    %c0_i32 = arith.constant 0 : i32
    %c0_i32_0 = arith.constant 0 : i32
    %c0_i32_1 = arith.constant 0 : i32
    return %c0_i32, %c0_i32_0 : i32, i32
  }
  func.func @transform_7(%arg0: i32) -> (i32, i32) {
    %c0_i32 = arith.constant 0 : i32
    %c0_i32_0 = arith.constant 0 : i32
    return %arg0, %c0_i32 : i32, i32
  }
}

</mosaic_0001>

<bundles_post_ra>
// kernel: tpu_custom_call.1
= control target key start
LH: loop header
LB: loop body
LE: loop exit
PB: predicated region body
PF: predicated region fallthrough
CT: control target
= control target key end

     0   :  { %12 = vsyncpa [#allocation3], 0  ;;  %s703_s0 = inlined_call_operand.vmem [shape: f32[8,32], index: 0, kind: input, shape index: {}]   ;;  %s704_s1 = inlined_call_operand.hbm [shape: bf16[32,64], index: 1, kind: input, shape index: {}]   ;;  %s705_s2 = inlined_call_operand.vmem [shape: bf16[64,64], index: 2, kind: input, shape index: {}]   ;;  %s706_s3 = inlined_call_operand.hbm [shape: bf16[64,64], index: 3, kind: input, shape index: {}]   ;;  %s707_s4 = inlined_call_operand.vmem [shape: bf16[64,8], index: 4, kind: input, shape index: {}]   ;;  %s708_s5 = inlined_call_operand.vmem [shape: f32[3,64], index: 5, kind: input, shape index: {}]   ;;  %s709_s6 = inlined_call_operand.vmem [shape: f32[1,8], index: 6, kind: input, shape index: {}]   ;;  %s710_s7 = inlined_call_operand.hbm [shape: f32[8,8], index: 7, kind: output, shape index: {}]  }
   0x1   :  { %13 = vsyncpa [#allocation6], 0 }
   0x2   :  { %14 = vsyncpa [#allocation4], 0  ;;  %s562_s24 = smov [#allocation2]   ;;  %s490_s28 = scalar_lea.hbm %s704_s1, 256 }
   0x3   :  { %s22_s25 = sshll.u32 %s562_s24, 4  ;;  %p491_p0 = scmp.ne.s32.totalorder %s704_s1, %s490_s28  ;;  %s23_s25 = int_to_ptr.vmem [resolvable:$true] %s22_s25 }
   0x4   :  { %p494_p1 = scmp.lt.u32.totalorder %s490_s28, %s704_s1 }
   0x6   :  { %p496_p2 = pnand %p494_p1, %p491_p0 }
   0x8   :  { %499 = shalt.err (!%p496_p2)
}
   0x9   :  { %s500_s10 = scalar_lea.vmem %s23_s25, 256  ;;  %p505_p4 = scmp.lt.s32.totalorder %s23_s25, %s23_s25 }
   0xa   :  { %p501_p3 = scmp.ne.s32.totalorder %s23_s25, %s500_s10  ;;  %p506_p5 = scmp.lt.s32.totalorder %s500_s10, %s500_s10 }
   0xc   :  { %p507_p6 = por %p506_p5, %p505_p4 }
   0xe   :  { %p508_p7 = pnand %p507_p6, %p501_p3 }
  0x10   :  { %511 = shalt.err (!%p508_p7)
}
  0x11   :  { %s563_s11 = smov 64   ;;  %s564_s12 = smov 4  }
  0x12   :  { %28 = dma.hbm_to_vmem [thread:$0]  %s704_s1, 256, %s23_s25, [#allocation3], %s563_s11, %s563_s11, %s564_s12  }
  0x13   :  { %s565_s15 = smov [#allocation5]   ;;  %s512_s19 = scalar_lea.hbm %s706_s3, 512 }
  0x14   :  { %s36_s16 = sshll.u32 %s565_s15, 4  ;;  %p513_p8 = scmp.ne.s32.totalorder %s706_s3, %s512_s19  ;;  %s37_s16 = int_to_ptr.vmem [resolvable:$true] %s36_s16 }
  0x15   :  { %p516_p9 = scmp.lt.u32.totalorder %s512_s19, %s706_s3 }
  0x17   :  { %p518_p10 = pnand %p516_p9, %p513_p8 }
  0x19   :  { %521 = shalt.err (!%p518_p10)
}
  0x1a   :  { %s522_s24 = scalar_lea.vmem %s37_s16, 512  ;;  %p527_p12 = scmp.lt.s32.totalorder %s37_s16, %s37_s16 }
  0x1b   :  { %p523_p11 = scmp.ne.s32.totalorder %s37_s16, %s522_s24  ;;  %p528_p13 = scmp.lt.s32.totalorder %s522_s24, %s522_s24 }
  0x1d   :  { %p529_p0 = por %p528_p13, %p527_p12 }
  0x1f   :  { %p530_p1 = pnand %p529_p0, %p523_p11 }
  0x21   :  { %533 = shalt.err (!%p530_p1)
}
  0x22   :  { %42 = dma.hbm_to_vmem [thread:$0]  %s706_s3, 512, %s37_s16, [#allocation6], %s563_s11, %s563_s11, %s564_s12  }
  0x23   :  { %556 = dma.done.wait [#allocation3], 256  }
  0x24   :  { %557 = vsyncadd [#allocation3], 4294967040 }
  0x25   :  { %558 = dma.done.wait [#allocation6], 512  }
  0x26   :  { %559 = vsyncadd [#allocation6], 4294966784  ;;  %v566_v0 = vmov 0.0   ;;  %vm567_vm0 = vmmov 0   ;;  %v476_v1 = vld [vmem:[#allocation2] sm:$0xff]   ;;  %v477_v2 = vld [vmem:[#allocation2 + $0x8] sm:$0xff]   ;;  %v63_v11 = vlaneseq }
  0x27   :  { %425 = vmatprep.subr.bf16.mxu0 %v566_v0  ;;  %429 = vmatprep.mubr.msk.bf16.mxu0 %vm567_vm0, %v566_v0  ;;  %v57_v3 = vld [vmem:[%s703_s0] sm:$0xff]  ;;  %vm79_vm1 = vcmask 261120   ;;  %v479_v5 = vld [vmem:[%s705_s2 + $0x8] sm:$0xff]   ;;  %v480_v7 = vld [vmem:[%s705_s2 + $0x10] sm:$0xff]   ;;  %vm161_vm2 = vcmask 523264   ;;  %s568_s21 = smov [#allocation7]  }
  0x28   :  { %433 = vmatprep.subr.bf16.mxu1 %v566_v0  ;;  %441 = vmatprep.mubr.msk.bf16.mxu1 %vm567_vm0, %v566_v0  ;;  %v478_v4 = vld [vmem:[%s705_s2] sm:$0xff]   ;;  %v58_v6 = vpack.c.bf16 %v57_v3, %v57_v3  ;;  %v481_v8 = vld [vmem:[%s705_s2 + $0x18] sm:$0xff]   ;;  %v482_v9 = vld [vmem:[#allocation5] sm:$0xff]   ;;  %v64_v12 = vshrl.u32 %v63_v11, 7  ;;  %s378_s22 = sshll.u32 %s568_s21, 4  ;;  %vm370_vm3 = vcmask 64512   ;;  %s379_s22 = int_to_ptr.vmem [resolvable:$true] %s378_s22 }
  0x29   :  { %426 = vmatpush3.bf16.msra.mxu0 %v476_v1  ;;  %434 = vmatpush3.bf16.msra.mxu1 %v478_v4  ;;  %v483_v10 = vld [vmem:[#allocation5 + $0x8] sm:$0xff]   ;;  %v56_v14 = vld [vmem:[%s708_s5] sm:$0x7]  ;;  %v485_v24 = vld [vmem:[#allocation5 + $0x18] sm:$0xff]   ;;  %p539_p3 = scmp.lt.s32.totalorder %s379_s22, %s379_s22 }
  0x2a   :  { %427 = vmatprep.subr.bf16.mxu0 %v566_v0  ;;  %435 = vmatprep.subr.bf16.mxu1 %v566_v0  ;;  %v65_v13 = vsub.s32 0, %v64_v12  ;;  %v484_v23 = vld [vmem:[#allocation5 + $0x10] sm:$0xff]   ;;  %v487_v26 = vld [vmem:[%s707_s4 + $0x8] sm:$0xff]   ;;  %v135_v27 = vsub.s32 1, %v64_v12  ;;  %v488_v36 = vld [vmem:[%s707_s4 + $0x10] sm:$0xff]   ;;  %v217_v38 = vsub.s32 2, %v64_v12 }
  0x2b   :  { %v486_v25 = vld [vmem:[%s707_s4] sm:$0xff]   ;;  %v489_v37 = vld [vmem:[%s707_s4 + $0x18] sm:$0xff]   ;;  %s534_s4 = scalar_lea.vmem %s379_s22, 128 }
  0x2c   :  { %v66_v15 = vrot.slane %v56_v14, %v65_v13  ;;  %v136_v28 = vrot.slane %v56_v14, %v135_v27  ;;  %v218_v39 = vrot.slane %v56_v14, %v217_v38  ;;  %v401_v47 = vld [vmem:[%s709_s6] ss:$0 sm:$0xff]  ;;  %p535_p2 = scmp.ne.s32.totalorder %s379_s22, %s534_s4  ;;  %p540_p4 = scmp.lt.s32.totalorder %s534_s4, %s534_s4 }
  0x2d   :  { %428 = vmatpush3.bf16.msra.mxu0 %v477_v2  ;;  %436 = vmatpush3.bf16.msra.mxu1 %v479_v5 }
  0x2e   :  { %445 = vmatprep.subr.bf16.mxu0 %v566_v0  ;;  %437 = vmatprep.subr.bf16.mxu1 %v566_v0  ;;  %p541_p5 = por %p540_p4, %p539_p3 }
  0x30   :  { %430 = vmatmul.mubr.msk.bf16.vlgmr.msra.gmra.mrb[0].mxu0 %vm79_vm1, %v58_v6  ;;  %p542_p6 = pnand %p541_p5, %p535_p2 }
  0x31   :  { %453 = vmatprep.mubr.msk.bf16.mxu0 %vm567_vm0, %v566_v0  ;;  %438 = vmatpush3.bf16.msra.mxu1 %v480_v7 }
  0x32   :  { %439 = vmatprep.subr.bf16.mxu1 %v566_v0  ;;  %446 = vmatpush3.bf16.msra.mxu0 %v482_v9 }
  0x33   :  { %447 = vmatprep.subr.bf16.mxu0 %v566_v0 }
  0x35   :  { %440 = vmatpush3.bf16.msra.mxu1 %v481_v8 }
  0x36   :  { %457 = vmatprep.subr.bf16.mxu1 %v566_v0  ;;  %448 = vmatpush3.bf16.msra.mxu0 %v483_v10 }
  0x37   :  { %449 = vmatprep.subr.bf16.mxu0 %v566_v0 }
  0x3a   :  { %450 = vmatpush3.bf16.msra.mxu0 %v484_v23 }
  0x3b   :  { %451 = vmatprep.subr.bf16.mxu0 %v566_v0 }
  0x3e   :  { %452 = vmatpush3.bf16.msra.mxu0 %v485_v24 }
 0x103   :  { %v117_v16 = vpop.f32.mrb[0].mxu0 }
 0x104   :  { %v118_v17 = vadd.f32 %v117_v16, %v66_v15  ;;  %v431_v18 = vpop.f32.mrb[1].mxu0 }
 0x105   :  { %v120_v19 = vpop.f32.mrb[2].mxu0 }
 0x106   :  { %v123_v20 = vmax.f32 %v118_v17, 0.0  ;;  %v432_v21 = vpop.f32.mrb[3].mxu0 }
 0x108   :  { %v124_v22 = vpack.c.bf16 %v123_v20, %v123_v20 }
 0x10a   :  { %442 = vmatmul.mubr.msk.bf16.vlgmr.msra.gmra.mrb[0].mxu1 %vm161_vm2, %v124_v22 }
 0x10b   :  { %465 = vmatprep.mubr.msk.bf16.mxu1 %vm567_vm0, %v566_v0  ;;  %458 = vmatpush3.bf16.msra.mxu1 %v486_v25 }
 0x10c   :  { %459 = vmatprep.subr.bf16.mxu1 %v566_v0 }
 0x10f   :  { %460 = vmatpush3.bf16.msra.mxu1 %v487_v26 }
 0x110   :  { %461 = vmatprep.subr.bf16.mxu1 %v566_v0 }
 0x113   :  { %462 = vmatpush3.bf16.msra.mxu1 %v488_v36 }
 0x114   :  { %463 = vmatprep.subr.bf16.mxu1 %v566_v0 }
 0x117   :  { %464 = vmatpush3.bf16.msra.mxu1 %v489_v37 }
 0x1dd   :  { %v199_v29 = vpop.f32.mrb[0].mxu1 }
 0x1de   :  { %v200_v30 = vadd.f32 %v199_v29, %v136_v28  ;;  %v443_v31 = vpop.f32.mrb[1].mxu1 }
 0x1df   :  { %v202_v32 = vpop.f32.mrb[2].mxu1 }
 0x1e0   :  { %v205_v33 = vmax.f32 %v200_v30, 0.0  ;;  %v444_v34 = vpop.f32.mrb[3].mxu1 }
 0x1e2   :  { %v206_v35 = vpack.c.bf16 %v205_v33, %v205_v33 }
 0x1e4   :  { %454 = vmatmul.mubr.msk.bf16.vlgmr.msra.gmra.mrb[4].mxu0 %vm161_vm2, %v206_v35 }
 0x2b7   :  { %v280_v40 = vpop.f32.mrb[4].mxu0 }
 0x2b8   :  { %v281_v41 = vadd.f32 %v280_v40, %v218_v39  ;;  %v455_v42 = vpop.f32.mrb[5].mxu0 }
 0x2b9   :  { %v283_v43 = vpop.f32.mrb[6].mxu0 }
 0x2ba   :  { %v286_v44 = vmax.f32 %v281_v41, 0.0  ;;  %v456_v45 = vpop.f32.mrb[7].mxu0 }
 0x2bc   :  { %v287_v46 = vpack.c.bf16 %v286_v44, %v286_v44 }
 0x2be   :  { %466 = vmatmul.mubr.msk.bf16.vlgmr.msra.gmra.mrb[4].mxu1 %vm161_vm2, %v287_v46 }
 0x391   :  { %v364_v48 = vpop.f32.mrb[4].mxu1 }
 0x392   :  { %v365_v49 = vadd.f32 %v401_v47, %v364_v48  ;;  %v467_v50 = vpop.f32.mrb[5].mxu1 }
 0x393   :  { %v367_v51 = vpop.f32.mrb[6].mxu1 }
 0x394   :  { %v468_v52 = vpop.f32.mrb[7].mxu1  ;;  %371 = vst.msk [vmem:[#allocation7] sm:$0xff] %vm370_vm3, %v365_v49 }
 0x395   :  { %545 = shalt.err (!%p542_p6)
}
 0x396   :  { %s546_s6 = scalar_lea.hbm %s710_s7, 128 }
 0x397   :  { %p547_p7 = scmp.ne.s32.totalorder %s710_s7, %s546_s6  ;;  %p550_p8 = scmp.lt.u32.totalorder %s546_s6, %s710_s7 }
 0x399   :  { %p552_p9 = pnand %p550_p8, %p547_p7 }
 0x39b   :  { %555 = shalt.err (!%p552_p9)
}
 0x39c   :  { %381 = dma.vmem_to_hbm [thread:$0]  %s379_s22, 128, %s710_s7, [#allocation4]  }
 0x39d   :  { %560 = dma.done.wait [#allocation4], 128  }
 0x39e   :  { %561 = vsyncadd [#allocation4], 4294967168 }
 0x39f   :  { %385 = vsyncpa [#allocation3], 1 }
 0x3a0   :  { %386 = vsyncpa [#allocation6], 1 }
 0x3a1   :  { %387 = vsyncpa [#allocation4], 1 }

</bundles_post_ra>
